<compile_context>
chip_gen: v7x
topology: tpu7x:2x2x1
jax: 0.10.0
libtpu: 0.0.40
codegen_flags: <defaults>
</compile_context>

<pallas_src>
import jax
import jax.numpy as jnp
from jax.experimental import pallas as pl
from jax.experimental.pallas import tpu as pltpu


# --------------------------------------------------------------------------
# Fused kernel: Gram accumulation + EMA blend + off-diagonal L1/L2 reduction.
# --------------------------------------------------------------------------
def _sdl_fused_kernel(coef_ref, x_ref, c_prev_ref, c_out_ref, reg_ref):
    step = pl.program_id(0)

    # init resident accumulator (the C output block itself)
    @pl.when(step == 0)
    def _():
        c_out_ref[...] = jnp.zeros_like(c_out_ref)

    # accumulate X_tile^T @ X_tile (contract over the batch rows, no transpose
    # materialized — the contraction is expressed directly on dim 0 of both).
    x = x_ref[...]
    c_out_ref[...] += jax.lax.dot_general(
        x, x,
        dimension_numbers=(((0,), (0,)), ((), ())),
        preferred_element_type=jnp.float32,
    )

    # finalize: EMA blend + off-diagonal L1/L2 regularizer
    @pl.when(step == pl.num_programs(0) - 1)
    def _():
        alpha = coef_ref[0]   # (1 - momentum) if initialized else 0.0
        beta = coef_ref[1]    # momentum/(n-1) if initialized else 1/(n-1)
        l1 = coef_ref[2]
        l2 = coef_ref[3]

        c = alpha * c_prev_ref[...] + beta * c_out_ref[...]
        c_out_ref[...] = c

        d0, d1 = c.shape
        row = jax.lax.broadcasted_iota(jnp.int32, (d0, d1), 0)
        col = jax.lax.broadcasted_iota(jnp.int32, (d0, d1), 1)
        eye = jnp.where(row == col, 1.0, 0.0)  # single diagonal mask

        abs_c = jnp.abs(c)
        sq_c = c * c
        reg_val = (l1 * (jnp.sum(abs_c) - jnp.sum(abs_c * eye))
                   + l2 * (jnp.sum(sq_c) - jnp.sum(sq_c * eye)))

        # lane-dense scalar store: broadcast across 128 lanes, slice outside.
        reg_ref[...] = jnp.full((1, 128), reg_val, dtype=jnp.float32)


# --------------------------------------------------------------------------
# Partial-Gram kernel: used when splitting the batch across TensorCores
# (leading "parallel" grid axis).  EMA + regularizer epilogue is tiny and is
# done in plain JAX on the combined sum.
# --------------------------------------------------------------------------
def _sdl_partial_gram_kernel(x_ref, gram_ref):
    @pl.when(pl.program_id(1) == 0)
    def _():
        gram_ref[...] = jnp.zeros_like(gram_ref)

    x = x_ref[...]
    gram_ref[...] += jax.lax.dot_general(
        x, x,
        dimension_numbers=(((0,), (0,)), ((), ())),
        preferred_element_type=jnp.float32,
    )


def _pick_block_n(n, d, itemsize, block_n, vmem_budget):
    """Largest tile <= block_n that fits the VMEM budget (double-buffered X
    plus two resident (d,d) f32 blocks)."""
    def need(bn):
        return 2 * bn * d * itemsize + 4 * d * d * 4 + 2 * 128 * 4

    while block_n > 8 and need(block_n) > vmem_budget:
        block_n //= 2
    return max(8, min(block_n, n)), need(min(block_n, n))


def sdl_forward(x, c_prev, momentum, l1, l2, initialized, *,
                block_n=512, num_partials=1, stream_bf16=False):
    """Returns (reg_scalar, C_new).

    `initialized` is a Python bool (module state).  `num_partials > 1` adds a
    leading parallel grid axis (use 2 on v7x to drive both TensorCores).
    `stream_bf16=True` streams X as bf16 (Gram accumulation stays f32)."""
    n, d = x.shape

    # Fold the 1/(n-1) Gram normalization and the init/EMA switch into two
    # scalar coefficients so the blend is a single fused op.
    if initialized:
        alpha = 1.0 - momentum
        beta = momentum / (n - 1)
    else:
        alpha = 0.0
        beta = 1.0 / (n - 1)

    if stream_bf16:
        x = x.astype(jnp.bfloat16)
    itemsize = jnp.dtype(x.dtype).itemsize

    # Conservative scoped-VMEM budget that is safe on v5e/v6e/v7x.
    vmem_budget = 48 * 1024 * 1024
    block_n, vmem_need = _pick_block_n(n, d, itemsize, block_n, vmem_budget)

    # Pad batch with zero rows (zero rows do not change X^T X); the 1/(n-1)
    # normalization uses the ORIGINAL n via `beta`.
    num_tiles = pl.cdiv(n, block_n)
    if num_partials > 1:
        num_tiles = pl.cdiv(num_tiles, num_partials) * num_partials
    n_pad = num_tiles * block_n
    if n_pad != n:
        x = jnp.pad(x, ((0, n_pad - n), (0, 0)))

    vmem_limit = int(min(vmem_need + (16 << 20), 64 << 20))

    if num_partials == 1:
        # ---------------- fully fused single-kernel path -----------------
        coefs = jnp.array([alpha, beta, l1, l2], dtype=jnp.float32)
        c_new, reg_row = pl.pallas_call(
            _sdl_fused_kernel,
            out_shape=(
                jax.ShapeDtypeStruct((d, d), jnp.float32),    # updated C
                jax.ShapeDtypeStruct((1, 128), jnp.float32),  # reg (lane-dense)
            ),
            grid=(num_tiles,),
            in_specs=[
                pl.BlockSpec(memory_space=pltpu.MemorySpace.SMEM),  # scalars
                pl.BlockSpec((block_n, d), lambda i: (i, 0)),       # X tile
                pl.BlockSpec((d, d), lambda i: (0, 0)),             # C_prev
            ],
            out_specs=(
                pl.BlockSpec((d, d), lambda i: (0, 0)),    # C_new (resident acc)
                pl.BlockSpec((1, 128), lambda i: (0, 0)),  # reg row
            ),
            compiler_params=pltpu.CompilerParams(
                dimension_semantics=("arbitrary",),        # reduction over batch
                vmem_limit_bytes=vmem_limit,
            ),
            cost_estimate=pl.CostEstimate(
                flops=2 * n_pad * d * d + 10 * d * d,
                transcendentals=0,
                bytes_accessed=itemsize * n_pad * d + 4 * (3 * d * d + 128 + 4),
            ),
        )(coefs, x, c_prev)
        return reg_row[0, 0], c_new

    # -------- split path: partial Grams per core + tiny JAX epilogue --------
    tiles_per_split = num_tiles // num_partials
    partials = pl.pallas_call(
        _sdl_partial_gram_kernel,
        out_shape=jax.ShapeDtypeStruct((num_partials, d, d), jnp.float32),
        grid=(num_partials, tiles_per_split),
        in_specs=[
            pl.BlockSpec((block_n, d),
                         lambda c, i: (c * tiles_per_split + i, 0)),
        ],
        out_specs=pl.BlockSpec((None, d, d), lambda c, i: (c, 0, 0)),
        compiler_params=pltpu.CompilerParams(
            dimension_semantics=("parallel", "arbitrary"),
            vmem_limit_bytes=vmem_limit,
        ),
        cost_estimate=pl.CostEstimate(
            flops=2 * n_pad * d * d,
            transcendentals=0,
            bytes_accessed=itemsize * n_pad * d + 4 * num_partials * d * d,
        ),
    )(x)

    gram = jnp.sum(partials, axis=0)
    c_new = alpha * c_prev + beta * gram
    dg_abs = jnp.abs(jnp.diagonal(c_new))
    dg_sq = jnp.diagonal(c_new) ** 2
    reg = (l1 * (jnp.sum(jnp.abs(c_new)) - jnp.sum(dg_abs))
           + l2 * (jnp.sum(c_new ** 2) - jnp.sum(dg_sq)))
    return reg, c_new


# --------------------------------------------------------------------------
# Pure-JAX reference (mirrors the PyTorch forward exactly).
# --------------------------------------------------------------------------
def reference_forward(x, c_prev, momentum, l1, l2, initialized):
    n = x.shape[0]
    ci = x.T @ x / (n - 1)
    c = (1.0 - momentum) * c_prev + momentum * ci if initialized else ci
    dg = jnp.diag(c)
    reg = l1 * (jnp.sum(jnp.abs(c)) - jnp.sum(jnp.abs(dg))) + \
          l2 * (jnp.sum(c ** 2) - jnp.sum(dg ** 2))
    return reg, c


if __name__ == "__main__":
    key = jax.random.PRNGKey(0)
    k1, k2, k3 = jax.random.split(key, 3)

    N, D = 256, 128                 # small batch, lane-dense feature dim
    momentum, l1, l2 = 0.1, 0.01, 0.001

    x1 = jax.random.normal(k1, (N, D), jnp.float32)
    x2 = jax.random.normal(k2, (N, D), jnp.float32)
    c0 = jnp.zeros((D, D), jnp.float32)   # module's initial self.C

    # First call: not initialized -> C = Ci
    reg1, c1 = sdl_forward(x1, c0, momentum, l1, l2, initialized=False)
    # Second call: initialized -> EMA blend with running C
    reg2, c2 = sdl_forward(x2, c1, momentum, l1, l2, initialized=True)
    jax.block_until_ready((reg1, c1, reg2, c2))

    r_reg1, r_c1 = reference_forward(x1, c0, momentum, l1, l2, False)
    r_reg2, r_c2 = reference_forward(x2, r_c1, momentum, l1, l2, True)

    assert jnp.allclose(c1, r_c1, atol=1e-3, rtol=1e-3)
    assert jnp.allclose(c2, r_c2, atol=1e-3, rtol=1e-3)
    assert jnp.allclose(reg1, r_reg1, atol=1e-3, rtol=1e-3)
    assert jnp.allclose(reg2, r_reg2, atol=1e-3, rtol=1e-3)

    # Ragged batch (exercises zero-padding of the last tile).
    N3 = 200
    x3 = jax.random.normal(k3, (N3, D), jnp.float32)
    reg3, c3 = sdl_forward(x3, c2, momentum, l1, l2, initialized=True,
                           block_n=128)
    r_reg3, r_c3 = reference_forward(x3, r_c2, momentum, l1, l2, True)
    jax.block_until_ready((reg3, c3))
    assert jnp.allclose(c3, r_c3, atol=1e-3, rtol=1e-3)
    assert jnp.allclose(reg3, r_reg3, atol=1e-3, rtol=1e-3)

    # Two-way batch split (v7x dual-TensorCore path); serializes harmlessly
    # on single-core chips.
    reg4, c4 = sdl_forward(x1, c0, momentum, l1, l2, initialized=False,
                           num_partials=2, block_n=128)
    jax.block_until_ready((reg4, c4))
    assert jnp.allclose(c4, r_c1, atol=1e-3, rtol=1e-3)
    assert jnp.allclose(reg4, r_reg1, atol=1e-3, rtol=1e-3)

    print("KERNEL_OK")
</pallas_src>

<mosaic_0001>
module attributes {stable_mosaic.version = 11 : i64} {
  func.func @_sdl_fused_kernel(%arg0: i32, %arg1: memref<4xf32, #tpu.memory_space<smem>>, %arg2: memref<256x128xf32, #tpu.memory_space<vmem>>, %arg3: memref<128x128xf32, #tpu.memory_space<vmem>>, %arg4: memref<128x128xf32, #tpu.memory_space<vmem>>, %arg5: memref<1x128xf32, #tpu.memory_space<vmem>>) attributes {dimension_semantics = [#tpu.dimension_semantics<arbitrary>], iteration_bounds = array<i64: 1>, scalar_prefetch = 0 : i64, scratch_operands = 0 : i64, tpu.core_type = #tpu.core_type<tc>, window_params = [{transform_indices = @transform_0, window_bounds = array<i64: 4>}, {transform_indices = @transform_1, window_bounds = array<i64: 256, 128>}, {pipeline_mode = #tpu.pipeline_mode<synchronous>, transform_indices = @transform_2, window_bounds = array<i64: 128, 128>}, {pipeline_mode = #tpu.pipeline_mode<synchronous>, transform_indices = @transform_3, window_bounds = array<i64: 128, 128>}, {pipeline_mode = #tpu.pipeline_mode<synchronous>, transform_indices = @transform_4, window_bounds = array<i64: 1, 128>}]} {
    %c0_i32 = arith.constant 0 : i32
    %0 = arith.cmpi eq, %arg0, %c0_i32 : i32
    %1 = arith.extui %0 : i1 to i32
    %c0_i32_0 = arith.constant 0 : i32
    %2 = arith.cmpi ne, %1, %c0_i32_0 : i32
    scf.if %2 {
      %cst_8 = arith.constant 0.000000e+00 : f32
      %11 = vector.broadcast %cst_8 : f32 to vector<128x128xf32>
      %c0_9 = arith.constant 0 : index
      %c0_10 = arith.constant 0 : index
      %12 = vector.load %arg4[%c0_9, %c0_10] : memref<128x128xf32, #tpu.memory_space<vmem>>, vector<128x128xf32>
      tpu.vector_store %arg4[%c0_9, %c0_10], %11 {strides = array<i32>} : memref<128x128xf32, #tpu.memory_space<vmem>>, vector<128x128xf32>,
    } else {
    }
    %c0 = arith.constant 0 : index
    %c0_1 = arith.constant 0 : index
    %3 = vector.load %arg2[%c0, %c0_1] : memref<256x128xf32, #tpu.memory_space<vmem>>, vector<256x128xf32>
    %c0_2 = arith.constant 0 : index
    %c0_3 = arith.constant 0 : index
    %4 = vector.load %arg4[%c0_2, %c0_3] : memref<128x128xf32, #tpu.memory_space<vmem>>, vector<128x128xf32>
    %cst = arith.constant dense<0.000000e+00> : vector<128x128xf32>
    %5 = tpu.matmul %3, %3, %cst {dimension_numbers = #tpu.dot_dimension_numbers<[0], [0], [1], [1], [0, 1, 1, 1], [], []>} : vector<256x128xf32>, vector<256x128xf32>, vector<128x128xf32> -> vector<128x128xf32>
    %6 = arith.addf %4, %5 : vector<128x128xf32>
    %c0_4 = arith.constant 0 : index
    %c0_5 = arith.constant 0 : index
    %7 = vector.load %arg4[%c0_4, %c0_5] : memref<128x128xf32, #tpu.memory_space<vmem>>, vector<128x128xf32>
    tpu.vector_store %arg4[%c0_4, %c0_5], %6 {strides = array<i32>} : memref<128x128xf32, #tpu.memory_space<vmem>>, vector<128x128xf32>,
    %c0_i32_6 = arith.constant 0 : i32
    %8 = arith.cmpi eq, %arg0, %c0_i32_6 : i32
    %9 = arith.extui %8 : i1 to i32
    %c0_i32_7 = arith.constant 0 : i32
    %10 = arith.cmpi ne, %9, %c0_i32_7 : i32
    scf.if %10 {
      %c0_8 = arith.constant 0 : index
      %11 = memref.load %arg1[%c0_8] : memref<4xf32, #tpu.memory_space<smem>>
      %c1 = arith.constant 1 : index
      %12 = memref.load %arg1[%c1] : memref<4xf32, #tpu.memory_space<smem>>
      %c2 = arith.constant 2 : index
      %13 = memref.load %arg1[%c2] : memref<4xf32, #tpu.memory_space<smem>>
      %c3 = arith.constant 3 : index
      %14 = memref.load %arg1[%c3] : memref<4xf32, #tpu.memory_space<smem>>
      %c0_9 = arith.constant 0 : index
      %c0_10 = arith.constant 0 : index
      %15 = vector.load %arg3[%c0_9, %c0_10] : memref<128x128xf32, #tpu.memory_space<vmem>>, vector<128x128xf32>
      %16 = vector.broadcast %11 : f32 to vector<128x128xf32>
      %17 = arith.mulf %16, %15 : vector<128x128xf32>
      %c0_11 = arith.constant 0 : index
      %c0_12 = arith.constant 0 : index
      %18 = vector.load %arg4[%c0_11, %c0_12] : memref<128x128xf32, #tpu.memory_space<vmem>>, vector<128x128xf32>
      %19 = vector.broadcast %12 : f32 to vector<128x128xf32>
      %20 = arith.mulf %19, %18 : vector<128x128xf32>
      %21 = arith.addf %17, %20 : vector<128x128xf32>
      %c0_13 = arith.constant 0 : index
      %c0_14 = arith.constant 0 : index
      %22 = vector.load %arg4[%c0_13, %c0_14] : memref<128x128xf32, #tpu.memory_space<vmem>>, vector<128x128xf32>
      tpu.vector_store %arg4[%c0_13, %c0_14], %21 {strides = array<i32>} : memref<128x128xf32, #tpu.memory_space<vmem>>, vector<128x128xf32>,
      %23 = tpu.iota {dimensions = array<i32: 0>} : vector<128x128xi32>
      %24 = tpu.iota {dimensions = array<i32: 1>} : vector<128x128xi32>
      %25 = arith.cmpi eq, %23, %24 : vector<128x128xi32>
      %cst_15 = arith.constant 1.000000e+00 : f32
      %cst_16 = arith.constant 0.000000e+00 : f32
      %26 = vector.broadcast %cst_15 : f32 to vector<128x128xf32>
      %27 = vector.broadcast %cst_16 : f32 to vector<128x128xf32>
      %28 = arith.select %25, %26, %27 : vector<128x128xi1>, vector<128x128xf32>
      %29 = math.absf %21 : vector<128x128xf32>
      %30 = arith.mulf %21, %21 : vector<128x128xf32>
      %31 = vector.shape_cast %29 : vector<128x128xf32> to vector<1x128x128xf32>
      %cst_17 = arith.constant dense<0.000000e+00> : vector<1xf32>
      %32 = vector.multi_reduction <add>, %31, %cst_17 [1, 2] : vector<1x128x128xf32> to vector<1xf32>
      %33 = vector.shape_cast %32 : vector<1xf32> to vector<1x1x1xf32>
      %34 = vector.extract %33[0, 0, 0] : f32 from vector<1x1x1xf32>
      %35 = arith.mulf %29, %28 : vector<128x128xf32>
      %36 = vector.shape_cast %35 : vector<128x128xf32> to vector<1x128x128xf32>
      %cst_18 = arith.constant dense<0.000000e+00> : vector<1xf32>
      %37 = vector.multi_reduction <add>, %36, %cst_18 [1, 2] : vector<1x128x128xf32> to vector<1xf32>
      %38 = vector.shape_cast %37 : vector<1xf32> to vector<1x1x1xf32>
      %39 = vector.extract %38[0, 0, 0] : f32 from vector<1x1x1xf32>
      %40 = arith.subf %34, %39 : f32
      %41 = arith.mulf %13, %40 : f32
      %42 = vector.shape_cast %30 : vector<128x128xf32> to vector<1x128x128xf32>
      %cst_19 = arith.constant dense<0.000000e+00> : vector<1xf32>
      %43 = vector.multi_reduction <add>, %42, %cst_19 [1, 2] : vector<1x128x128xf32> to vector<1xf32>
      %44 = vector.shape_cast %43 : vector<1xf32> to vector<1x1x1xf32>
      %45 = vector.extract %44[0, 0, 0] : f32 from vector<1x1x1xf32>
      %46 = arith.mulf %30, %28 : vector<128x128xf32>
      %47 = vector.shape_cast %46 : vector<128x128xf32> to vector<1x128x128xf32>
      %cst_20 = arith.constant dense<0.000000e+00> : vector<1xf32>
      %48 = vector.multi_reduction <add>, %47, %cst_20 [1, 2] : vector<1x128x128xf32> to vector<1xf32>
      %49 = vector.shape_cast %48 : vector<1xf32> to vector<1x1x1xf32>
      %50 = vector.extract %49[0, 0, 0] : f32 from vector<1x1x1xf32>
      %51 = arith.subf %45, %50 : f32
      %52 = arith.mulf %14, %51 : f32
      %53 = arith.addf %41, %52 : f32
      %54 = vector.broadcast %53 : f32 to vector<1x128xf32>
      %c0_21 = arith.constant 0 : index
      %c0_22 = arith.constant 0 : index
      %55 = vector.load %arg5[%c0_21, %c0_22] : memref<1x128xf32, #tpu.memory_space<vmem>>, vector<1x128xf32>
      tpu.vector_store %arg5[%c0_21, %c0_22], %54 {strides = array<i32>} : memref<1x128xf32, #tpu.memory_space<vmem>>, vector<1x128xf32>,
    } else {
    }
    return
  }
  func.func @transform_0(%arg0: i32) -> i32 {
    %c0_i32 = arith.constant 0 : i32
    %c0_i32_0 = arith.constant 0 : i32
    return %c0_i32 : i32
  }
  func.func @transform_1(%arg0: i32) -> (i32, i32) {
    %c0_i32 = arith.constant 0 : i32
    %c0_i32_0 = arith.constant 0 : i32
    return %arg0, %c0_i32 : i32, i32
  }
  func.func @transform_2(%arg0: i32) -> (i32, i32) {
    %c0_i32 = arith.constant 0 : i32
    %c0_i32_0 = arith.constant 0 : i32
    %c0_i32_1 = arith.constant 0 : i32
    return %c0_i32, %c0_i32_0 : i32, i32
  }
  func.func @transform_3(%arg0: i32) -> (i32, i32) {
    %c0_i32 = arith.constant 0 : i32
    %c0_i32_0 = arith.constant 0 : i32
    %c0_i32_1 = arith.constant 0 : i32
    return %c0_i32, %c0_i32_0 : i32, i32
  }
  func.func @transform_4(%arg0: i32) -> (i32, i32) {
    %c0_i32 = arith.constant 0 : i32
    %c0_i32_0 = arith.constant 0 : i32
    %c0_i32_1 = arith.constant 0 : i32
    return %c0_i32, %c0_i32_0 : i32, i32
  }
}

</mosaic_0001>

<bundles_post_ra>
// kernel: tpu_custom_call.1
= control target key start
LH: loop header
LB: loop body
LE: loop exit
PB: predicated region body
PF: predicated region fallthrough
CT: control target
= control target key end

     0   :  { %10 = vsyncpa [#allocation5], 0  ;;  %s1298_s0 = inlined_call_operand.hbm [shape: f32[4], index: 0, kind: input, shape index: {}]   ;;  %s1299_s1 = inlined_call_operand.hbm [shape: f32[256,128], index: 1, kind: input, shape index: {}]   ;;  %s1300_s2 = inlined_call_operand.hbm [shape: f32[128,128], index: 2, kind: input, shape index: {}]   ;;  %s1301_s3 = inlined_call_operand.hbm [shape: f32[128,128], index: 3, kind: output, shape index: {0}]   ;;  %s1302_s4 = inlined_call_operand.hbm [shape: f32[1,128], index: 4, kind: output, shape index: {1}]  }
   0x1   :  { %11 = vsyncpa [#allocation3], 0 }
   0x2   :  { %12 = vsyncpa [#allocation8], 0 }
   0x3   :  { %13 = vsyncpa [#allocation4], 0 }
   0x4   :  { %14 = vsyncpa [#allocation11], 0  ;;  %s981_s17 = scalar_lea.hbm %s1298_s0, 16 }
   0x5   :  { %p982_p0 = scmp.ne.s32.totalorder %s1298_s0, %s981_s17  ;;  %p985_p1 = scmp.lt.u32.totalorder %s981_s17, %s1298_s0 }
   0x7   :  { %p987_p2 = pnand %p985_p1, %p982_p0 }
   0x9   :  { %990 = shalt.err (!%p987_p2)
}
   0xa   :  { %s1089_s22 = smov [#allocation2]   ;;  %s1090_s25 = smov [#allocation6]  }
   0xb   :  { %22 = dma.hbm_to_smem %s1298_s0, 16, %s1089_s22, [#allocation5]  }
   0xc   :  { %s28_s26 = sshll.u32 %s1090_s25, 4  ;;  %s991_s29 = scalar_lea.hbm %s1299_s1, 4096  ;;  %s29_s26 = int_to_ptr.vmem [resolvable:$true] %s28_s26 }
   0xd   :  { %p992_p3 = scmp.ne.s32.totalorder %s1299_s1, %s991_s29  ;;  %p995_p4 = scmp.lt.u32.totalorder %s991_s29, %s1299_s1 }
   0xf   :  { %p997_p5 = pnand %p995_p4, %p992_p3 }
  0x11   :  { %1000 = shalt.err (!%p997_p5)
}
  0x12   :  { %s1001_s8 = scalar_lea.vmem %s29_s26, 4096  ;;  %p1006_p7 = scmp.lt.s32.totalorder %s29_s26, %s29_s26 }
  0x13   :  { %p1002_p6 = scmp.ne.s32.totalorder %s29_s26, %s1001_s8  ;;  %p1007_p8 = scmp.lt.s32.totalorder %s1001_s8, %s1001_s8 }
  0x15   :  { %p1008_p9 = por %p1007_p8, %p1006_p7 }
  0x17   :  { %p1009_p10 = pnand %p1008_p9, %p1002_p6 }
  0x19   :  { %1012 = shalt.err (!%p1009_p10)
}
  0x1a   :  { %s1091_s0 = smov 128   ;;  %s1092_s9 = smov 8  }
  0x1b   :  { %34 = dma.hbm_to_vmem [thread:$0]  %s1299_s1, 4096, %s29_s26, [#allocation3], %s1091_s0, %s1091_s0, %s1092_s9  }
  0x1c   :  { %s1093_s12 = smov [#allocation7]   ;;  %s1013_s16 = scalar_lea.hbm %s1300_s2, 2048 }
  0x1d   :  { %s40_s13 = sshll.u32 %s1093_s12, 4  ;;  %p1014_p11 = scmp.ne.s32.totalorder %s1300_s2, %s1013_s16  ;;  %s41_s13 = int_to_ptr.vmem [resolvable:$true] %s40_s13 }
  0x1e   :  { %p1017_p12 = scmp.lt.u32.totalorder %s1013_s16, %s1300_s2 }
  0x20   :  { %p1019_p13 = pnand %p1017_p12, %p1014_p11 }
  0x22   :  { %1022 = shalt.err (!%p1019_p13)
}
  0x23   :  { %s1023_s21 = scalar_lea.vmem %s41_s13, 2048  ;;  %p1028_p1 = scmp.lt.s32.totalorder %s41_s13, %s41_s13 }
  0x24   :  { %p1024_p0 = scmp.ne.s32.totalorder %s41_s13, %s1023_s21  ;;  %p1029_p2 = scmp.lt.s32.totalorder %s1023_s21, %s1023_s21 }
  0x26   :  { %p1030_p3 = por %p1029_p2, %p1028_p1 }
  0x28   :  { %p1031_p4 = pnand %p1030_p3, %p1024_p0 }
  0x2a   :  { %1034 = shalt.err (!%p1031_p4)
}
  0x2b   :  { %46 = dma.hbm_to_vmem [thread:$0]  %s1300_s2, 2048, %s41_s13, [#allocation8], %s1091_s0, %s1091_s0, %s1092_s9  }
  0x2c   :  { %1079 = dma.done.wait [#allocation5], 16  }
  0x2d   :  { %1080 = vsyncadd [#allocation5], 4294967280 }
  0x2e   :  { %1081 = dma.done.wait [#allocation3], 4096  }
  0x2f   :  { %1082 = vsyncadd [#allocation3], 4294963200 }
  0x30   :  { %1083 = dma.done.wait [#allocation8], 2048  }
  0x31   :  { %1084 = vsyncadd [#allocation8], 4294965248 }
  0x32   :  { %56 = sfence }
  0x33   :  { %v77_v0 = vld [vmem:[#allocation6] sm:$0xff]  ;;  %v78_v2 = vld [vmem:[#allocation6 + $0x8] sm:$0xff]  ;;  %v95_v6 = vld [vmem:[#allocation6 + $0x90] sm:$0xff]  ;;  %s369_s2 = sld [smem:[#allocation2]]  ;;  %s722_s23 = sld [smem:[#allocation2 + $0x1]] }
  0x34   :  { %v93_v1 = vld [vmem:[#allocation6 + $0x80] sm:$0xff]  ;;  %v94_v4 = vld [vmem:[#allocation6 + $0x88] sm:$0xff]  ;;  %v807_v5 = vpack.c.bf16 %v78_v2, %v77_v0  ;;  %v96_v7 = vld [vmem:[#allocation6 + $0x98] sm:$0xff]  ;;  %s1095_s24 = smov [#allocation9]  }
  0x35   :  { %v869_v3 = vpack.i.bf16 %v77_v0, %v93_v1  ;;  %v805_v8 = vpack.c.bf16 %v94_v4, %v93_v1  ;;  %v871_v9 = vpack.i.bf16 %v78_v2, %v94_v4  ;;  %v809_v10 = vpack.c.bf16 %v96_v7, %v95_v6  ;;  %v79_v11 = vld [vmem:[#allocation6 + $0x10] sm:$0xff]  ;;  %v80_v12 = vld [vmem:[#allocation6 + $0x18] sm:$0xff]  ;;  %v97_v14 = vld [vmem:[#allocation6 + $0xa0] sm:$0xff]  ;;  %s694_s25 = sshll.u32 %s1095_s24, 4  ;;  %s695_s25 = int_to_ptr.vmem [resolvable:$true] %s694_s25 }
  0x36   :  { %v811_v13 = vpack.c.bf16 %v80_v12, %v79_v11  ;;  %v98_v15 = vld [vmem:[#allocation6 + $0xa8] sm:$0xff]  ;;  %v873_v17 = vpack.i.bf16 %v79_v11, %v95_v6  ;;  %v81_v18 = vld [vmem:[#allocation6 + $0x20] sm:$0xff]  ;;  %v99_v21 = vld [vmem:[#allocation6 + $0xb0] sm:$0xff]  ;;  %v875_v24 = vpack.i.bf16 %v80_v12, %v96_v7  ;;  %s1035_s26 = scalar_lea.vmem %s695_s25, 2048  ;;  %p1040_p6 = scmp.lt.s32.totalorder %s695_s25, %s695_s25 }
  0x37   :  { %870 = vxpose.xlu0.b32.start [1/16] %v869_v3, 128  ;;  %806 = vmatprep.subr.bf16.mxu0 %v805_v8  ;;  %v813_v16 = vpack.c.bf16 %v98_v15, %v97_v14  ;;  %v82_v19 = vld [vmem:[#allocation6 + $0x28] sm:$0xff]  ;;  %v100_v22 = vld [vmem:[#allocation6 + $0xb8] sm:$0xff]  ;;  %v83_v25 = vld [vmem:[#allocation6 + $0x30] sm:$0xff]  ;;  %v877_v31 = vpack.i.bf16 %v81_v18, %v97_v14  ;;  %p1036_p5 = scmp.ne.s32.totalorder %s695_s25, %s1035_s26  ;;  %p1041_p7 = scmp.lt.s32.totalorder %s1035_s26, %s1035_s26 }
  0x38   :  { %808 = vmatpush3.bf16.msra.mxu0 %v807_v5  ;;  %837 = vmatprep.subr.bf16.mxu1 %v805_v8  ;;  %v815_v20 = vpack.c.bf16 %v82_v19, %v81_v18  ;;  %v817_v23 = vpack.c.bf16 %v100_v22, %v99_v21  ;;  %v84_v26 = vld [vmem:[#allocation6 + $0x38] sm:$0xff]  ;;  %v101_v28 = vld [vmem:[#allocation6 + $0xc0] sm:$0xff]  ;;  %v102_v29 = vld [vmem:[#allocation6 + $0xc8] sm:$0xff]  ;;  %v879_v38 = vpack.i.bf16 %v82_v19, %v98_v15 }
  0x39   :  { %810 = vmatprep.subr.bf16.mxu0 %v809_v10  ;;  %845 = vmatpush3.bf16.msra.mxu1 %v807_v5  ;;  %v819_v27 = vpack.c.bf16 %v84_v26, %v83_v25  ;;  %v821_v30 = vpack.c.bf16 %v102_v29, %v101_v28  ;;  %v85_v32 = vld [vmem:[#allocation6 + $0x40] sm:$0xff]  ;;  %v86_v33 = vld [vmem:[#allocation6 + $0x48] sm:$0xff]  ;;  %v103_v35 = vld [vmem:[#allocation6 + $0xd0] sm:$0xff]  ;;  %v881_v45 = vpack.i.bf16 %v83_v25, %v99_v21  ;;  %p1042_p8 = por %p1041_p7, %p1040_p6 }
  0x3a   :  { %838 = vmatprep.subr.bf16.mxu1 %v809_v10  ;;  %v823_v34 = vpack.c.bf16 %v86_v33, %v85_v32  ;;  %v104_v36 = vld [vmem:[#allocation6 + $0xd8] sm:$0xff]  ;;  %v87_v39 = vld [vmem:[#allocation6 + $0x50] sm:$0xff]  ;;  %v105_v42 = vld [vmem:[#allocation6 + $0xe0] sm:$0xff]  ;;  %v883_v52 = vpack.i.bf16 %v84_v26, %v100_v22  ;;  %v885_v56 = vpack.i.bf16 %v85_v32, %v101_v28  ;;  %v887_v57 = vpack.i.bf16 %v86_v33, %v102_v29 }
  0x3b   :  { %872 = vxpose.xlu0.b32.cont [2/16] %v871_v9, 128  ;;  %v825_v37 = vpack.c.bf16 %v104_v36, %v103_v35  ;;  %v88_v40 = vld [vmem:[#allocation6 + $0x58] sm:$0xff]  ;;  %v106_v43 = vld [vmem:[#allocation6 + $0xe8] sm:$0xff]  ;;  %v89_v46 = vld [vmem:[#allocation6 + $0x60] sm:$0xff]  ;;  %v889_v58 = vpack.i.bf16 %v87_v39, %v103_v35  ;;  %p1043_p9 = pnand %p1042_p8, %p1036_p5 }
  0x3c   :  { %812 = vmatpush3.bf16.msra.mxu0 %v811_v13  ;;  %v827_v41 = vpack.c.bf16 %v88_v40, %v87_v39  ;;  %v829_v44 = vpack.c.bf16 %v106_v43, %v105_v42  ;;  %v90_v47 = vld [vmem:[#allocation6 + $0x68] sm:$0xff]  ;;  %v107_v49 = vld [vmem:[#allocation6 + $0xf0] sm:$0xff]  ;;  %v108_v50 = vld [vmem:[#allocation6 + $0xf8] sm:$0xff]  ;;  %v891_v59 = vpack.i.bf16 %v88_v40, %v104_v36  ;;  %v893_v60 = vpack.i.bf16 %v89_v46, %v105_v42 }
  0x3d   :  { %814 = vmatprep.subr.bf16.mxu0 %v813_v16  ;;  %846 = vmatpush3.bf16.msra.mxu1 %v811_v13  ;;  %v831_v48 = vpack.c.bf16 %v90_v47, %v89_v46  ;;  %v833_v51 = vpack.c.bf16 %v108_v50, %v107_v49  ;;  %v91_v53 = vld [vmem:[#allocation6 + $0x70] sm:$0xff]  ;;  %v92_v54 = vld [vmem:[#allocation6 + $0x78] sm:$0xff]  ;;  %v895_v61 = vpack.i.bf16 %v90_v47, %v106_v43 }
  0x3e   :  { %839 = vmatprep.subr.bf16.mxu1 %v813_v16  ;;  %v835_v55 = vpack.c.bf16 %v92_v54, %v91_v53  ;;  %v897_v62 = vpack.i.bf16 %v91_v53, %v107_v49  ;;  %v899_v63 = vpack.i.bf16 %v92_v54, %v108_v50  ;;  %v471_v49 = vlaneseq }
  0x3f   :  { %874 = vxpose.xlu0.b32.cont [3/16] %v873_v17, 128  ;;  %v1166_v54 = vstv %s722_s23 }
  0x40   :  { %816 = vmatpush3.bf16.msra.mxu0 %v815_v20 }
  0x41   :  { %818 = vmatprep.subr.bf16.mxu0 %v817_v23  ;;  %847 = vmatpush3.bf16.msra.mxu1 %v815_v20 }
  0x42   :  { %840 = vmatprep.subr.bf16.mxu1 %v817_v23 }
  0x43   :  { %876 = vxpose.xlu0.b32.cont [4/16] %v875_v24, 128 }
  0x44   :  { %820 = vmatpush3.bf16.msra.mxu0 %v819_v27 }
  0x45   :  { %822 = vmatprep.subr.bf16.mxu0 %v821_v30  ;;  %848 = vmatpush3.bf16.msra.mxu1 %v819_v27 }
  0x46   :  { %841 = vmatprep.subr.bf16.mxu1 %v821_v30 }
  0x47   :  { %878 = vxpose.xlu0.b32.cont [5/16] %v877_v31, 128 }
  0x48   :  { %824 = vmatpush3.bf16.msra.mxu0 %v823_v34 }
  0x49   :  { %826 = vmatprep.subr.bf16.mxu0 %v825_v37  ;;  %849 = vmatpush3.bf16.msra.mxu1 %v823_v34 }
  0x4a   :  { %842 = vmatprep.subr.bf16.mxu1 %v825_v37 }
  0x4b   :  { %880 = vxpose.xlu0.b32.cont [6/16] %v879_v38, 128 }
  0x4c   :  { %828 = vmatpush3.bf16.msra.mxu0 %v827_v41 }
  0x4d   :  { %830 = vmatprep.subr.bf16.mxu0 %v829_v44  ;;  %850 = vmatpush3.bf16.msra.mxu1 %v827_v41 }
  0x4e   :  { %843 = vmatprep.subr.bf16.mxu1 %v829_v44 }
  0x4f   :  { %882 = vxpose.xlu0.b32.cont [7/16] %v881_v45, 128 }
  0x50   :  { %832 = vmatpush3.bf16.msra.mxu0 %v831_v48 }
  0x51   :  { %834 = vmatprep.subr.bf16.mxu0 %v833_v51  ;;  %851 = vmatpush3.bf16.msra.mxu1 %v831_v48 }
  0x52   :  { %844 = vmatprep.subr.bf16.mxu1 %v833_v51  ;;  %v373_v51 = vld [vmem:[#allocation7] sm:$0xff] }
  0x53   :  { %884 = vxpose.xlu0.b32.cont [8/16] %v883_v52, 128  ;;  %v1164_v52 = vstv %s369_s2 }
  0x54   :  { %836 = vmatpush3.bf16.msra.mxu0 %v835_v55 }
  0x55   :  { %852 = vmatpush3.bf16.msra.mxu1 %v835_v55  ;;  %v390_v55 = vmul.f32 %v1164_v52, %v373_v51 }
  0x57   :  { %886 = vxpose.xlu0.b32.cont [9/16] %v885_v56, 128  ;;  %v1169_v56 = vshrl.u32 %v471_v49, 7 }
  0x5b   :  { %888 = vxpose.xlu0.b32.cont [10/16] %v887_v57, 128 }
  0x5f   :  { %890 = vxpose.xlu0.b32.cont [11/16] %v889_v58, 128  ;;  %v1171_v58 = vand.u32 127, %v471_v49 }
  0x61   :  { %vm490_vm0 = vcmp.eq.s32.totalorder %v1169_v56, %v1171_v58 }
  0x63   :  { %892 = vxpose.xlu0.b32.cont [12/16] %v891_v59, 128 }
  0x67   :  { %894 = vxpose.xlu0.b32.cont [13/16] %v893_v60, 128  ;;  %v374_v60 = vld [vmem:[#allocation7 + $0x8] sm:$0xff] }
  0x6b   :  { %896 = vxpose.xlu0.b32.cont [14/16] %v895_v61, 128 }
  0x6f   :  { %898 = vxpose.xlu0.b32.cont [15/16] %v897_v62, 128 }
  0x73   :  { %900 = vxpose.xlu0.b32.end [16/16] %v899_v63, 128  ;;  %v473_v63 = vadd.s32 8, %v1169_v56 }
  0x75   :  { %vm491_vm1 = vcmp.eq.s32.totalorder %v473_v63, %v1171_v58 }
  0xb7   :  { %v901_v0 = vpop.trf.xlu0 }
  0xb8   :  { %v902_v1 = vunpack.i.l.bf16 %v901_v0  ;;  %v905_v2 = vunpack.i.h.bf16 %v901_v0 }
  0xba   :  { %253 = vmatprep.mubr.f32.mxu0 %v902_v1  ;;  %v391_v1 = vmul.f32 %v1164_v52, %v374_v60  ;;  %v379_v60 = vld [vmem:[#allocation7 + $0x30] sm:$0xff] }
  0xbb   :  { %v906_v3 = vpop.trf.xlu0  ;;  %254 = vmatmul.mubr.f32.vlgmr.msra.gmra.mrb[0].mxu0 %v905_v2 }
  0xbc   :  { %v907_v4 = vunpack.i.l.bf16 %v906_v3  ;;  %v910_v5 = vunpack.i.h.bf16 %v906_v3 }
  0xbe   :  { %258 = vmatprep.mubr.f32.mxu0 %v907_v4  ;;  %v474_v4 = vadd.s32 16, %v1169_v56 }
  0xbf   :  { %v911_v6 = vpop.trf.xlu0  ;;  %259 = vmatmul.mubr.f32.gmra.mrb[2].mxu0 %v910_v5 }
  0xc0   :  { %v912_v7 = vunpack.i.l.bf16 %v911_v6  ;;  %v915_v8 = vunpack.i.h.bf16 %v911_v6  ;;  %vm492_vm2 = vcmp.eq.s32.totalorder %v474_v4, %v1171_v58 }
  0xc2   :  { %263 = vmatprep.mubr.f32.mxu0 %v912_v7  ;;  %v375_v7 = vld [vmem:[#allocation7 + $0x10] sm:$0xff] }
  0xc3   :  { %v916_v9 = vpop.trf.xlu0  ;;  %264 = vmatmul.mubr.f32.gmra.mrb[4].mxu0 %v915_v8 }
  0xc4   :  { %v917_v10 = vunpack.i.l.bf16 %v916_v9  ;;  %v920_v11 = vunpack.i.h.bf16 %v916_v9 }
  0xc6   :  { %268 = vmatprep.mubr.f32.mxu0 %v917_v10  ;;  %v1094_v10 = vmov 0.0  }
  0xc7   :  { %v921_v12 = vpop.trf.xlu0  ;;  %269 = vmatmul.mubr.f32.gmra.mrb[6].mxu0 %v920_v11  ;;  %v506_v11 = vsel %vm490_vm0, 1.0, %v1094_v10 }
  0xc8   :  { %v922_v13 = vunpack.i.l.bf16 %v921_v12  ;;  %v925_v14 = vunpack.i.h.bf16 %v921_v12 }
  0xca   :  { %273 = vmatprep.mubr.f32.mxu0 %v922_v13 }
  0xcb   :  { %v926_v15 = vpop.trf.xlu0  ;;  %274 = vmatmul.mubr.f32.gmra.mrb[8].mxu0 %v925_v14  ;;  %v376_v14 = vld [vmem:[#allocation7 + $0x18] sm:$0xff] }
  0xcc   :  { %v927_v16 = vunpack.i.l.bf16 %v926_v15  ;;  %v930_v17 = vunpack.i.h.bf16 %v926_v15  ;;  %v507_v15 = vsel %vm491_vm1, 1.0, %v1094_v10 }
  0xce   :  { %278 = vmatprep.mubr.f32.mxu0 %v927_v16  ;;  %v392_v16 = vmul.f32 %v1164_v52, %v375_v7  ;;  %v396_v7 = vmul.f32 %v1164_v52, %v379_v60 }
  0xcf   :  { %v931_v18 = vpop.trf.xlu0  ;;  %279 = vmatmul.mubr.f32.gmra.mrb[10].mxu0 %v930_v17 }
  0xd0   :  { %v932_v19 = vunpack.i.l.bf16 %v931_v18  ;;  %v935_v20 = vunpack.i.h.bf16 %v931_v18  ;;  %v475_v18 = vadd.s32 24, %v1169_v56 }
  0xd2   :  { %283 = vmatprep.mubr.f32.mxu0 %v932_v19  ;;  %vm493_vm3 = vcmp.eq.s32.totalorder %v475_v18, %v1171_v58 }
  0xd3   :  { %v936_v21 = vpop.trf.xlu0  ;;  %284 = vmatmul.mubr.f32.gmra.mrb[12].mxu0 %v935_v20 }
  0xd4   :  { %v937_v22 = vunpack.i.l.bf16 %v936_v21  ;;  %v940_v23 = vunpack.i.h.bf16 %v936_v21 }
  0xd6   :  { %288 = vmatprep.mubr.f32.mxu0 %v937_v22 }
  0xd7   :  { %v941_v24 = vpop.trf.xlu0  ;;  %289 = vmatmul.mubr.f32.gmra.mrb[14].mxu0 %v940_v23 }
  0xd8   :  { %v942_v25 = vunpack.i.l.bf16 %v941_v24  ;;  %v945_v26 = vunpack.i.h.bf16 %v941_v24 }
  0xda   :  { %293 = vmatprep.mubr.f32.mxu1 %v942_v25  ;;  %v393_v25 = vmul.f32 %v1164_v52, %v376_v14 }
  0xdb   :  { %v946_v27 = vpop.trf.xlu0  ;;  %294 = vmatmul.mubr.f32.vlgmr.msra.gmra.mrb[0].mxu1 %v945_v26  ;;  %v476_v26 = vadd.s32 32, %v1169_v56 }
  0xdc   :  { %v947_v28 = vunpack.i.l.bf16 %v946_v27  ;;  %v950_v29 = vunpack.i.h.bf16 %v946_v27 }
  0xdd   :  { %vm494_vm4 = vcmp.eq.s32.totalorder %v476_v26, %v1171_v58 }
  0xde   :  { %298 = vmatprep.mubr.f32.mxu1 %v947_v28  ;;  %v510_v63 = vsel %vm494_vm4, 1.0, %v1094_v10 }
  0xdf   :  { %v951_v30 = vpop.trf.xlu0  ;;  %299 = vmatmul.mubr.f32.gmra.mrb[2].mxu1 %v950_v29 }
  0xe0   :  { %v952_v31 = vunpack.i.l.bf16 %v951_v30  ;;  %v955_v32 = vunpack.i.h.bf16 %v951_v30 }
  0xe2   :  { %303 = vmatprep.mubr.f32.mxu1 %v952_v31 }
  0xe3   :  { %v956_v33 = vpop.trf.xlu0  ;;  %304 = vmatmul.mubr.f32.gmra.mrb[4].mxu1 %v955_v32  ;;  %v377_v32 = vld [vmem:[#allocation7 + $0x20] sm:$0xff] }
  0xe4   :  { %v957_v34 = vunpack.i.l.bf16 %v956_v33  ;;  %v960_v35 = vunpack.i.h.bf16 %v956_v33 }
  0xe6   :  { %308 = vmatprep.mubr.f32.mxu1 %v957_v34  ;;  %v508_v34 = vsel %vm492_vm2, 1.0, %v1094_v10 }
  0xe7   :  { %v961_v36 = vpop.trf.xlu0  ;;  %309 = vmatmul.mubr.f32.gmra.mrb[6].mxu1 %v960_v35 }
  0xe8   :  { %v962_v37 = vunpack.i.l.bf16 %v961_v36  ;;  %v965_v38 = vunpack.i.h.bf16 %v961_v36 }
  0xea   :  { %313 = vmatprep.mubr.f32.mxu1 %v962_v37 }
  0xeb   :  { %v966_v39 = vpop.trf.xlu0  ;;  %314 = vmatmul.mubr.f32.gmra.mrb[8].mxu1 %v965_v38 }
  0xec   :  { %v967_v40 = vunpack.i.l.bf16 %v966_v39  ;;  %v970_v41 = vunpack.i.h.bf16 %v966_v39  ;;  %v477_v39 = vadd.s32 40, %v1169_v56 }
  0xee   :  { %318 = vmatprep.mubr.f32.mxu1 %v967_v40  ;;  %vm495_vm5 = vcmp.eq.s32.totalorder %v477_v39, %v1171_v58 }
  0xef   :  { %v971_v42 = vpop.trf.xlu0  ;;  %319 = vmatmul.mubr.f32.gmra.mrb[10].mxu1 %v970_v41 }
  0xf0   :  { %v972_v43 = vunpack.i.l.bf16 %v971_v42  ;;  %v975_v44 = vunpack.i.h.bf16 %v971_v42 }
  0xf2   :  { %323 = vmatprep.mubr.f32.mxu1 %v972_v43  ;;  %v394_v43 = vmul.f32 %v1164_v52, %v377_v32 }
  0xf3   :  { %v976_v45 = vpop.trf.xlu0  ;;  %324 = vmatmul.mubr.f32.gmra.mrb[12].mxu1 %v975_v44  ;;  %v509_v44 = vsel %vm493_vm3, 1.0, %v1094_v10 }
  0xf4   :  { %v980_v46 = vunpack.i.h.bf16 %v976_v45  ;;  %v977_v47 = vunpack.i.l.bf16 %v976_v45 }
  0xf6   :  { %328 = vmatprep.mubr.f32.mxu1 %v977_v47  ;;  %v478_v47 = vadd.s32 48, %v1169_v56 }
  0xf7   :  { %329 = vmatmul.mubr.f32.gmra.mrb[14].mxu1 %v980_v46  ;;  %v378_v46 = vld [vmem:[#allocation7 + $0x28] sm:$0xff] }
  0xf8   :  { %vm496_vm6 = vcmp.eq.s32.totalorder %v478_v47, %v1171_v58 }
 0x18e   :  { %v757_v48 = vpop.f32.mrb[0].mxu0 }
 0x18f   :  { %v758_v50 = vpop.f32.mrb[1].mxu0 }
 0x190   :  { %v759_v53 = vadd.f32 %v758_v50, %v757_v48 }
 0x192   :  { %v760_v57 = vpop.f32.mrb[2].mxu0  ;;  %v423_v61 = vmul.f32 %v759_v53, %v1166_v54 }
 0x193   :  { %v761_v59 = vpop.f32.mrb[3].mxu0 }
 0x194   :  { %v762_v62 = vadd.f32 %v761_v59, %v760_v57  ;;  %v439_v0 = vadd.f32 %v423_v61, %v390_v55 }
 0x196   :  { %v763_v2 = vpop.f32.mrb[4].mxu0  ;;  %455 = vst [vmem:[#allocation9] sm:$0xff] %v439_v0  ;;  %v424_v5 = vmul.f32 %v762_v62, %v1166_v54  ;;  %v522_v8 = vand.u32 2147483647, %v439_v0  ;;  %v538_v9 = vmul.f32 %v439_v0, %v439_v0  ;;  %v395_v0 = vmul.f32 %v1164_v52, %v378_v46 }
 0x197   :  { %v764_v3 = vpop.f32.mrb[5].mxu0 }
 0x198   :  { %v765_v6 = vadd.f32 %v764_v3, %v763_v2  ;;  %v440_v12 = vadd.f32 %v424_v5, %v391_v1  ;;  %v578_v23 = vmul.f32 %v522_v8, %v506_v11  ;;  %v644_v24 = vmul.f32 %v538_v9, %v506_v11 }
 0x199   :  { %v511_v5 = vsel %vm495_vm5, 1.0, %v1094_v10 }
 0x19a   :  { %v766_v13 = vpop.f32.mrb[6].mxu0  ;;  %456 = vst [vmem:[#allocation9 + $0x8] sm:$0xff] %v440_v12  ;;  %v523_v19 = vand.u32 2147483647, %v440_v12  ;;  %v539_v20 = vmul.f32 %v440_v12, %v440_v12  ;;  %v425_v21 = vmul.f32 %v765_v6, %v1166_v54 }
 0x19b   :  { %v767_v17 = vpop.f32.mrb[7].mxu0 }
 0x19c   :  { %v768_v22 = vadd.f32 %v767_v17, %v766_v13  ;;  %v554_v27 = vadd.f32 %v523_v19, %v522_v8  ;;  %v579_v28 = vmul.f32 %v523_v19, %v507_v15  ;;  %v620_v29 = vadd.f32 %v539_v20, %v538_v9  ;;  %v380_v8 = vld [vmem:[#allocation7 + $0x38] sm:$0xff] }
 0x19d   :  { %v645_v30 = vmul.f32 %v539_v20, %v507_v15  ;;  %v441_v33 = vadd.f32 %v425_v21, %v392_v16  ;;  %v479_v9 = vadd.s32 56, %v1169_v56 }
 0x19e   :  { %v769_v31 = vpop.f32.mrb[8].mxu0  ;;  %v594_v36 = vadd.f32 %v579_v28, %v578_v23  ;;  %v426_v42 = vmul.f32 %v768_v22, %v1166_v54  ;;  %v397_v22 = vmul.f32 %v1164_v52, %v380_v8  ;;  %v381_v23 = vld [vmem:[#allocation7 + $0x40] sm:$0xff] }
 0x19f   :  { %v770_v35 = vpop.f32.mrb[9].mxu0  ;;  %v660_v37 = vadd.f32 %v645_v30, %v644_v24  ;;  %457 = vst [vmem:[#allocation9 + $0x10] sm:$0xff] %v441_v33  ;;  %v524_v40 = vand.u32 2147483647, %v441_v33  ;;  %v540_v41 = vmul.f32 %v441_v33, %v441_v33  ;;  %v480_v24 = vadd.s32 64, %v1169_v56 }
 0x1a0   :  { %v771_v38 = vadd.f32 %v770_v35, %v769_v31  ;;  %v442_v55 = vadd.f32 %v426_v42, %v393_v25  ;;  %vm497_vm7 = vcmp.eq.s32.totalorder %v479_v9, %v1171_v58  ;;  %v398_v35 = vmul.f32 %v1164_v52, %v381_v23 }
 0x1a1   :  { %v555_v48 = vadd.f32 %v554_v27, %v524_v40  ;;  %v580_v49 = vmul.f32 %v524_v40, %v508_v34  ;;  %v621_v50 = vadd.f32 %v620_v29, %v540_v41  ;;  %v646_v51 = vmul.f32 %v540_v41, %v508_v34  ;;  %v382_v40 = vld [vmem:[#allocation7 + $0x48] sm:$0xff] }
 0x1a2   :  { %v772_v45 = vpop.f32.mrb[10].mxu0  ;;  %v427_v57 = vmul.f32 %v771_v38, %v1166_v54  ;;  %458 = vst [vmem:[#allocation9 + $0x18] sm:$0xff] %v442_v55  ;;  %v525_v1 = vand.u32 2147483647, %v442_v55  ;;  %v541_v2 = vmul.f32 %v442_v55, %v442_v55  ;;  %v512_v34 = vsel %vm496_vm6, 1.0, %v1094_v10 }
 0x1a3   :  { %v773_v53 = vpop.f32.mrb[11].mxu0  ;;  %v595_v61 = vadd.f32 %v594_v36, %v580_v49  ;;  %v661_v62 = vadd.f32 %v660_v37, %v646_v51  ;;  %v513_v41 = vsel %vm497_vm7, 1.0, %v1094_v10  ;;  %vm498_vm8 = vcmp.eq.s32.totalorder %v480_v24, %v1171_v58 }
 0x1a4   :  { %v774_v59 = vadd.f32 %v773_v53, %v772_v45  ;;  %v443_v3 = vadd.f32 %v427_v57, %v394_v43  ;;  %v556_v11 = vadd.f32 %v555_v48, %v525_v1  ;;  %v581_v12 = vmul.f32 %v525_v1, %v509_v44  ;;  %v383_v43 = vld [vmem:[#allocation7 + $0x50] sm:$0xff]  ;;  %v384_v57 = vld [vmem:[#allocation7 + $0x58] sm:$0xff] }
 0x1a5   :  { %v622_v13 = vadd.f32 %v621_v50, %v541_v2  ;;  %v647_v14 = vmul.f32 %v541_v2, %v509_v44  ;;  %v481_v44 = vadd.s32 72, %v1169_v56  ;;  %v482_v45 = vadd.s32 80, %v1169_v56 }
 0x1a6   :  { %v775_v4 = vpop.f32.mrb[12].mxu0  ;;  %459 = vst [vmem:[#allocation9 + $0x20] sm:$0xff] %v443_v3  ;;  %v526_v15 = vand.u32 2147483647, %v443_v3  ;;  %v542_v16 = vmul.f32 %v443_v3, %v443_v3  ;;  %v428_v17 = vmul.f32 %v774_v59, %v1166_v54  ;;  %v596_v19 = vadd.f32 %v595_v61, %v581_v12 }
 0x1a7   :  { %v776_v6 = vpop.f32.mrb[13].mxu0  ;;  %v662_v20 = vadd.f32 %v661_v62, %v647_v14  ;;  %v399_v55 = vmul.f32 %v1164_v52, %v382_v40  ;;  %v400_v62 = vmul.f32 %v1164_v52, %v383_v43  ;;  %vm499_vm9 = vcmp.eq.s32.totalorder %v481_v44, %v1171_v58 }
 0x1a8   :  { %v777_v18 = vadd.f32 %v776_v6, %v775_v4  ;;  %v557_v25 = vadd.f32 %v556_v11, %v526_v15  ;;  %v582_v26 = vmul.f32 %v526_v15, %v510_v63  ;;  %v623_v27 = vadd.f32 %v622_v13, %v542_v16 }
 0x1a9   :  { %v648_v28 = vmul.f32 %v542_v16, %v510_v63  ;;  %v444_v30 = vadd.f32 %v428_v17, %v395_v0  ;;  %v514_v63 = vsel %vm498_vm8, 1.0, %v1094_v10  ;;  %vm500_vm10 = vcmp.eq.s32.totalorder %v482_v45, %v1171_v58 }
 0x1aa   :  { %v778_v21 = vpop.f32.mrb[14].mxu0  ;;  %v597_v32 = vadd.f32 %v596_v19, %v582_v26  ;;  %v429_v38 = vmul.f32 %v777_v18, %v1166_v54  ;;  %v483_v17 = vadd.s32 88, %v1169_v56  ;;  %v515_v26 = vsel %vm499_vm9, 1.0, %v1094_v10 }
 0x1ab   :  { %v779_v29 = vpop.f32.mrb[15].mxu0  ;;  %v663_v33 = vadd.f32 %v662_v20, %v648_v28  ;;  %460 = vst [vmem:[#allocation9 + $0x28] sm:$0xff] %v444_v30  ;;  %v527_v36 = vand.u32 2147483647, %v444_v30  ;;  %v543_v37 = vmul.f32 %v444_v30, %v444_v30 }
 0x1ac   :  { %v780_v31 = vadd.f32 %v779_v29, %v778_v21  ;;  %v445_v50 = vadd.f32 %v429_v38, %v396_v7  ;;  %vm501_vm11 = vcmp.eq.s32.totalorder %v483_v17, %v1171_v58 }
 0x1ad   :  { %v558_v46 = vadd.f32 %v557_v25, %v527_v36  ;;  %v583_v47 = vmul.f32 %v527_v36, %v511_v5  ;;  %v624_v48 = vadd.f32 %v623_v27, %v543_v37  ;;  %v649_v49 = vmul.f32 %v543_v37, %v511_v5 }
 0x1ae   :  { %v781_v39 = vpop.f32.mrb[0].mxu1  ;;  %v430_v51 = vmul.f32 %v780_v31, %v1166_v54  ;;  %461 = vst [vmem:[#allocation9 + $0x30] sm:$0xff] %v445_v50  ;;  %v528_v0 = vand.u32 2147483647, %v445_v50  ;;  %v544_v1 = vmul.f32 %v445_v50, %v445_v50  ;;  %v1227_v5 = vmul.f32 %v1164_v52, %v384_v57 }
 0x1af   :  { %v782_v42 = vpop.f32.mrb[1].mxu1  ;;  %v598_v59 = vadd.f32 %v597_v32, %v583_v47  ;;  %v664_v60 = vadd.f32 %v663_v33, %v649_v49  ;;  %v484_v33 = vadd.s32 96, %v1169_v56  ;;  %v385_v47 = vld [vmem:[#allocation7 + $0x60] sm:$0xff] }
 0x1b0   :  { %v783_v53 = vadd.f32 %v782_v42, %v781_v39  ;;  %v446_v2 = vadd.f32 %v430_v51, %v397_v22  ;;  %v584_v6 = vmul.f32 %v528_v0, %v512_v34  ;;  %v625_v7 = vadd.f32 %v624_v48, %v544_v1 }
 0x1b1   :  { %v650_v8 = vmul.f32 %v544_v1, %v512_v34  ;;  %v559_v14 = vadd.f32 %v558_v46, %v528_v0  ;;  %v516_v34 = vsel %vm500_vm10, 1.0, %v1094_v10  ;;  %v402_v0 = vmul.f32 %v1164_v52, %v385_v47 }
 0x1b2   :  { %v784_v61 = vpop.f32.mrb[2].mxu1  ;;  %462 = vst [vmem:[#allocation9 + $0x38] sm:$0xff] %v446_v2  ;;  %v529_v9 = vand.u32 2147483647, %v446_v2  ;;  %v545_v11 = vmul.f32 %v446_v2, %v446_v2  ;;  %v431_v12 = vmul.f32 %v783_v53, %v1166_v54  ;;  %v599_v18 = vadd.f32 %v598_v59, %v584_v6 }
 0x1b3   :  { %v785_v3 = vpop.f32.mrb[3].mxu1  ;;  %v665_v19 = vadd.f32 %v664_v60, %v650_v8  ;;  %vm502_vm12 = vcmp.eq.s32.totalorder %v484_v33, %v1171_v58  ;;  %v388_v33 = vld [vmem:[#allocation7 + $0x78] sm:$0xff] }
 0x1b4   :  { %v786_v4 = vadd.f32 %v785_v3, %v784_v61  ;;  %v585_v15 = vmul.f32 %v529_v9, %v513_v41  ;;  %v651_v20 = vmul.f32 %v545_v11, %v513_v41  ;;  %v447_v21 = vadd.f32 %v431_v12, %v398_v35 }
 0x1b5   :  { %v560_v24 = vadd.f32 %v559_v14, %v529_v9  ;;  %v626_v25 = vadd.f32 %v625_v7, %v545_v11  ;;  %v517_v9 = vsel %vm501_vm11, 1.0, %v1094_v10 }
 0x1b6   :  { %v787_v13 = vpop.f32.mrb[4].mxu1  ;;  %v432_v22 = vmul.f32 %v786_v4, %v1166_v54  ;;  %v600_v27 = vadd.f32 %v599_v18, %v585_v15  ;;  %463 = vst [vmem:[#allocation9 + $0x40] sm:$0xff] %v447_v21  ;;  %v546_v28 = vmul.f32 %v447_v21, %v447_v21  ;;  %v530_v31 = vand.u32 2147483647, %v447_v21  ;;  %v386_v4 = vld [vmem:[#allocation7 + $0x68] sm:$0xff] }
 0x1b7   :  { %v788_v16 = vpop.f32.mrb[5].mxu1  ;;  %v666_v35 = vadd.f32 %v665_v19, %v651_v20 }
 0x1b8   :  { %v789_v23 = vadd.f32 %v788_v16, %v787_v13  ;;  %v448_v29 = vadd.f32 %v432_v22, %v399_v55  ;;  %v561_v39 = vadd.f32 %v560_v24, %v530_v31  ;;  %v627_v41 = vadd.f32 %v626_v25, %v546_v28  ;;  %v387_v22 = vld [vmem:[#allocation7 + $0x70] sm:$0xff] }
 0x1b9   :  { %v586_v42 = vmul.f32 %v530_v31, %v514_v63  ;;  %v652_v43 = vmul.f32 %v546_v28, %v514_v63  ;;  %v485_v63 = vadd.s32 104, %v1169_v56  ;;  %v486_v25 = vadd.s32 112, %v1169_v56 }
 0x1ba   :  { %v790_v30 = vpop.f32.mrb[6].mxu1  ;;  %464 = vst [vmem:[#allocation9 + $0x48] sm:$0xff] %v448_v29  ;;  %v433_v36 = vmul.f32 %v789_v23, %v1166_v54  ;;  %v531_v38 = vand.u32 2147483647, %v448_v29  ;;  %v547_v40 = vmul.f32 %v448_v29, %v448_v29 }
 0x1bb   :  { %v791_v32 = vpop.f32.mrb[7].mxu1  ;;  %v601_v45 = vadd.f32 %v600_v27, %v586_v42  ;;  %v667_v55 = vadd.f32 %v666_v35, %v652_v43  ;;  %vm503_vm13 = vcmp.eq.s32.totalorder %v485_v63, %v1171_v58  ;;  %v487_v43 = vadd.s32 120, %v1169_v56 }
 0x1bc   :  { %v792_v37 = vadd.f32 %v791_v32, %v790_v30  ;;  %v449_v44 = vadd.f32 %v433_v36, %v400_v62  ;;  %v562_v48 = vadd.f32 %v561_v39, %v531_v38  ;;  %v587_v49 = vmul.f32 %v531_v38, %v515_v26 }
 0x1bd   :  { %v628_v51 = vadd.f32 %v627_v41, %v547_v40  ;;  %v653_v53 = vmul.f32 %v547_v40, %v515_v26  ;;  %v518_v26 = vsel %vm502_vm12, 1.0, %v1094_v10  ;;  %v519_v35 = vsel %vm503_vm13, 1.0, %v1094_v10 }
 0x1be   :  { %v793_v46 = vpop.f32.mrb[8].mxu1  ;;  %465 = vst [vmem:[#allocation9 + $0x50] sm:$0xff] %v449_v44  ;;  %v434_v57 = vmul.f32 %v792_v37, %v1166_v54  ;;  %v532_v60 = vand.u32 2147483647, %v449_v44  ;;  %v548_v61 = vmul.f32 %v449_v44, %v449_v44  ;;  %v602_v62 = vadd.f32 %v601_v45, %v587_v49 }
 0x1bf   :  { %v794_v50 = vpop.f32.mrb[9].mxu1  ;;  %v668_v1 = vadd.f32 %v667_v55, %v653_v53  ;;  %vm504_vm14 = vcmp.eq.s32.totalorder %v486_v25, %v1171_v58  ;;  %vm505_vm15 = vcmp.eq.s32.totalorder %v487_v43, %v1171_v58 }
 0x1c0   :  { %v795_v59 = vadd.f32 %v794_v50, %v793_v46  ;;  %v450_v2 = vadd.f32 %v434_v57, %v1227_v5  ;;  %v563_v6 = vadd.f32 %v562_v48, %v532_v60  ;;  %v629_v7 = vadd.f32 %v628_v51, %v548_v61 }
 0x1c1   :  { %v588_v11 = vmul.f32 %v532_v60, %v516_v34  ;;  %v654_v12 = vmul.f32 %v548_v61, %v516_v34  ;;  %v403_v5 = vmul.f32 %v1164_v52, %v386_v4  ;;  %v404_v34 = vmul.f32 %v1164_v52, %v387_v22 }
 0x1c2   :  { %v796_v3 = vpop.f32.mrb[10].mxu1  ;;  %466 = vst [vmem:[#allocation9 + $0x58] sm:$0xff] %v450_v2  ;;  %v435_v13 = vmul.f32 %v795_v59, %v1166_v54  ;;  %v533_v15 = vand.u32 2147483647, %v450_v2  ;;  %v549_v16 = vmul.f32 %v450_v2, %v450_v2  ;;  %v405_v51 = vmul.f32 %v1164_v52, %v388_v33 }
 0x1c3   :  { %v797_v8 = vpop.f32.mrb[11].mxu1  ;;  %v603_v18 = vadd.f32 %v602_v62, %v588_v11  ;;  %v669_v19 = vadd.f32 %v668_v1, %v654_v12  ;;  %v520_v60 = vsel %vm504_vm14, 1.0, %v1094_v10 }
 0x1c4   :  { %v798_v14 = vadd.f32 %v797_v8, %v796_v3  ;;  %v451_v20 = vadd.f32 %v435_v13, %v402_v0  ;;  %v564_v23 = vadd.f32 %v563_v6, %v533_v15  ;;  %v630_v17 = vadd.f32 %v629_v7, %v549_v16 }
 0x1c5   :  { %v589_v27 = vmul.f32 %v533_v15, %v517_v9  ;;  %v655_v28 = vmul.f32 %v549_v16, %v517_v9  ;;  %v521_v7 = vsel %vm505_vm15, 1.0, %v1094_v10 }
 0x1c6   :  { %v799_v21 = vpop.f32.mrb[12].mxu1  ;;  %467 = vst [vmem:[#allocation9 + $0x60] sm:$0xff] %v451_v20  ;;  %v436_v29 = vmul.f32 %v798_v14, %v1166_v54  ;;  %v534_v31 = vand.u32 2147483647, %v451_v20  ;;  %v550_v32 = vmul.f32 %v451_v20, %v451_v20 }
 0x1c7   :  { %v800_v24 = vpop.f32.mrb[13].mxu1  ;;  %v604_v36 = vadd.f32 %v603_v18, %v589_v27  ;;  %v670_v37 = vadd.f32 %v669_v19, %v655_v28 }
 0x1c8   :  { %v801_v30 = vadd.f32 %v800_v24, %v799_v21  ;;  %v452_v38 = vadd.f32 %v436_v29, %v403_v5  ;;  %v565_v40 = vadd.f32 %v564_v23, %v534_v31  ;;  %v631_v41 = vadd.f32 %v630_v17, %v550_v32 }
 0x1c9   :  { %v590_v44 = vmul.f32 %v534_v31, %v518_v26  ;;  %v656_v46 = vmul.f32 %v550_v32, %v518_v26 }
 0x1ca   :  { %v802_v39 = vpop.f32.mrb[14].mxu1  ;;  %468 = vst [vmem:[#allocation9 + $0x68] sm:$0xff] %v452_v38  ;;  %v437_v47 = vmul.f32 %v801_v30, %v1166_v54  ;;  %v535_v49 = vand.u32 2147483647, %v452_v38  ;;  %v551_v50 = vmul.f32 %v452_v38, %v452_v38 }
 0x1cb   :  { %v803_v42 = vpop.f32.mrb[15].mxu1  ;;  %v605_v45 = vadd.f32 %v604_v36, %v590_v44  ;;  %v671_v53 = vadd.f32 %v670_v37, %v656_v46 }
 0x1cc   :  { %v804_v48 = vadd.f32 %v803_v42, %v802_v39  ;;  %v453_v55 = vadd.f32 %v437_v47, %v404_v34  ;;  %v566_v57 = vadd.f32 %v565_v40, %v535_v49  ;;  %v632_v59 = vadd.f32 %v631_v41, %v551_v50 }
 0x1cd   :  { %v591_v56 = vmul.f32 %v535_v49, %v519_v35  ;;  %v657_v61 = vmul.f32 %v551_v50, %v519_v35 }
 0x1ce   :  { %469 = vst [vmem:[#allocation9 + $0x70] sm:$0xff] %v453_v55  ;;  %v438_v0 = vmul.f32 %v804_v48, %v1166_v54  ;;  %v536_v63 = vand.u32 2147483647, %v453_v55  ;;  %v552_v62 = vmul.f32 %v453_v55, %v453_v55 }
 0x1cf   :  { %v606_v1 = vadd.f32 %v605_v45, %v591_v56  ;;  %v672_v2 = vadd.f32 %v671_v53, %v657_v61 }
 0x1d0   :  { %v454_v3 = vadd.f32 %v438_v0, %v405_v51  ;;  %v567_v52 = vadd.f32 %v566_v57, %v536_v63  ;;  %v633_v4 = vadd.f32 %v632_v59, %v552_v62  ;;  %v592_v6 = vmul.f32 %v536_v63, %v520_v60 }
 0x1d1   :  { %v658_v8 = vmul.f32 %v552_v62, %v520_v60 }
 0x1d2   :  { %470 = vst [vmem:[#allocation9 + $0x78] sm:$0xff] %v454_v3  ;;  %v537_v9 = vand.u32 2147483647, %v454_v3  ;;  %v553_v11 = vmul.f32 %v454_v3, %v454_v3  ;;  %v607_v12 = vadd.f32 %v606_v1, %v592_v6 }
 0x1d3   :  { %v673_v13 = vadd.f32 %v672_v2, %v658_v8 }
 0x1d4   :  { %v568_v14 = vadd.f32 %v567_v52, %v537_v9  ;;  %v634_v54 = vadd.f32 %v633_v4, %v553_v11  ;;  %v593_v15 = vmul.f32 %v537_v9, %v521_v7  ;;  %v659_v16 = vmul.f32 %v553_v11, %v521_v7 }
 0x1d6   :  { %569 = vadd.xlane.f32.xlu1 %v568_v14  ;;  %v608_v58 = vadd.f32 %v607_v12, %v593_v15  ;;  %v674_v5 = vadd.f32 %v673_v13, %v659_v16 }
 0x1da   :  { %635 = vadd.xlane.f32.xlu1 %v634_v54 }
 0x1de   :  { %609 = vadd.xlane.f32.xlu1 %v608_v58 }
 0x1e2   :  { %675 = vadd.xlane.f32.xlu1 %v674_v5 }
 0x1e3   :  { %1046 = shalt.err (!%p1043_p9)
}
 0x1e4   :  { %s1047_s29 = scalar_lea.hbm %s1301_s3, 2048 }
 0x1e5   :  { %p1048_p10 = scmp.ne.s32.totalorder %s1301_s3, %s1047_s29  ;;  %p1051_p11 = scmp.lt.u32.totalorder %s1047_s29, %s1301_s3 }
 0x1e7   :  { %p1053_p12 = pnand %p1051_p11, %p1048_p10 }
 0x1e9   :  { %1056 = shalt.err (!%p1053_p12)
}
 0x1ea   :  { %700 = dma.vmem_to_hbm [thread:$0]  %s695_s25, 2048, %s1301_s3, [#allocation4], %s1091_s0, %s1091_s0, %s1092_s9  }
 0x1eb   :  { %s723_s3 = sld [smem:[#allocation2 + $0x2]]  ;;  %s724_s9 = sld [smem:[#allocation2 + $0x3]] }
 0x1ec   :  { %s1096_s18 = smov [#allocation10]  }
 0x1ed   :  { %s707_s19 = sshll.u32 %s1096_s18, 4  ;;  %s708_s19 = int_to_ptr.vmem [resolvable:$true] %s707_s19 }
 0x1ee   :  { %s1057_s21 = scalar_lea.vmem %s708_s19, 16  ;;  %s1061_s1 = scalar_lea.vmem %s708_s19, 32 }
 0x1ef   :  { %p1058_p13 = scmp.ne.s32.totalorder %s708_s19, %s1057_s21  ;;  %p1062_p0 = scmp.lt.s32.totalorder %s708_s19, %s708_s19 }
 0x1f0   :  { %p1063_p1 = scmp.lt.s32.totalorder %s1061_s1, %s1057_s21 }
 0x1f2   :  { %p1064_p2 = por %p1063_p1, %p1062_p0 }
 0x1f4   :  { %p1065_p3 = pnand %p1064_p2, %p1058_p13 }
 0x263   :  { %v570_v10 = vpop.xlane.xlu1 %569 }
 0x264   :  { %v571_v18 = vrot.slane %v570_v10, 4 }
 0x266   :  { %v572_v19 = vadd.f32 %v571_v18, %v570_v10 }
 0x267   :  { %v636_v20 = vpop.xlane.xlu1 %635 }
 0x268   :  { %v573_v21 = vrot.slane %v572_v19, 2  ;;  %v637_v22 = vrot.slane %v636_v20, 4 }
 0x26a   :  { %v638_v23 = vadd.f32 %v637_v22, %v636_v20  ;;  %v574_v17 = vadd.f32 %v573_v21, %v572_v19 }
 0x26b   :  { %v610_v24 = vpop.xlane.xlu1 %609 }
 0x26c   :  { %v639_v25 = vrot.slane %v638_v23, 2  ;;  %v611_v26 = vrot.slane %v610_v24, 4  ;;  %v575_v27 = vrot.slane %v574_v17, 1 }
 0x26e   :  { %v612_v28 = vadd.f32 %v611_v26, %v610_v24  ;;  %v576_v29 = vadd.f32 %v575_v27, %v574_v17  ;;  %v640_v31 = vadd.f32 %v639_v25, %v638_v23 }
 0x26f   :  { %v676_v30 = vpop.xlane.xlu1 %675 }
 0x270   :  { %v613_v32 = vrot.slane %v612_v28, 2  ;;  %v677_v34 = vrot.slane %v676_v30, 4  ;;  %853 = vpush %v576_v29  ;;  %v641_v37 = vrot.slane %v640_v31, 1 }
 0x272   :  { %v678_v35 = vadd.f32 %v677_v34, %v676_v30  ;;  %v614_v36 = vadd.f32 %v613_v32, %v612_v28  ;;  %v642_v41 = vadd.f32 %v641_v37, %v640_v31 }
 0x274   :  { %v679_v38 = vrot.slane %v678_v35, 2  ;;  %v615_v39 = vrot.slane %v614_v36, 1 }
 0x276   :  { %v680_v33 = vadd.f32 %v679_v38, %v678_v35  ;;  %v616_v40 = vadd.f32 %v615_v39, %v614_v36 }
 0x278   :  { %855 = vpush %v616_v40  ;;  %v681_v42 = vrot.slane %v680_v33, 1 }
 0x279   :  { %857 = vpush %v642_v41 }
 0x27a   :  { %v682_v43 = vadd.f32 %v681_v42, %v680_v33 }
 0x27c   :  { %859 = vpush %v682_v43 }
 0x2a1   :  { %s854_s0 = spop %853 }
 0x2a9   :  { %s856_s11 = spop %855 }
 0x2aa   :  { %s618_s12 = ssub.f32 %s854_s0, %s856_s11  ;;  %s858_s13 = spop %857 }
 0x2ac   :  { %s619_s16 = smul.f32 %s723_s3, %s618_s12 }
 0x2ad   :  { %s860_s14 = spop %859 }
 0x2ae   :  { %s684_s15 = ssub.f32 %s858_s13, %s860_s14 }
 0x2b0   :  { %s685_s17 = smul.f32 %s724_s9, %s684_s15 }
 0x2b2   :  { %s686_s20 = sadd.f32 %s685_s17, %s619_s16 }
 0x2b4   :  { %v687_v44 = vstv %s686_s20 }
 0x2b5   :  { %688 = vst [vmem:[#allocation10] sm:$0x1] %v687_v44 }
 0x2b6   :  { %1068 = shalt.err (!%p1065_p3)
}
 0x2b7   :  { %s1069_s23 = scalar_lea.hbm %s1302_s4, 16 }
 0x2b8   :  { %p1070_p4 = scmp.ne.s32.totalorder %s1302_s4, %s1069_s23  ;;  %p1073_p5 = scmp.lt.u32.totalorder %s1069_s23, %s1302_s4 }
 0x2ba   :  { %p1075_p6 = pnand %p1073_p5, %p1070_p4 }
 0x2bc   :  { %1078 = shalt.err (!%p1075_p6)
}
 0x2bd   :  { %710 = dma.vmem_to_hbm [thread:$0]  %s708_s19, 16, %s1302_s4, [#allocation11]  }
 0x2be   :  { %1085 = dma.done.wait [#allocation4], 2048  }
 0x2bf   :  { %1086 = vsyncadd [#allocation4], 4294965248 }
 0x2c0   :  { %1087 = dma.done.wait [#allocation11], 16  }
 0x2c1   :  { %1088 = vsyncadd [#allocation11], 4294967280 }
 0x2c2   :  { %717 = vsyncpa [#allocation3], 1 }
 0x2c3   :  { %718 = vsyncpa [#allocation8], 1 }
 0x2c4   :  { %719 = vsyncpa [#allocation4], 1 }
 0x2c5   :  { %720 = vsyncpa [#allocation11], 1 }
 0x2c6   :  { %721 = vsyncpa [#allocation5], 1 }

</bundles_post_ra>
